<compile_context>
chip_gen: v5e
topology: v5e:2x2
jax: 0.10.0
libtpu: 0.0.40
codegen_flags: <defaults>
</compile_context>

<pallas_src>
import functools

import jax
import jax.numpy as jnp
from jax import lax
from jax.experimental import pallas as pl
from jax.experimental.pallas import tpu as pltpu


def _round_up(x: int, m: int) -> int:
    return ((x + m - 1) // m) * m


def _pad2d(a, rows, cols):
    return jnp.pad(a, ((0, rows - a.shape[0]), (0, cols - a.shape[1])))


# -----------------------------------------------------------------------------
# Pre-packed parameter container (arrays are pytree leaves, meta is static).
# -----------------------------------------------------------------------------
@jax.tree_util.register_pytree_node_class
class PackedMLP:
    def __init__(self, w0, b0, wm, bm, wl, bl, *, n_mid, din, dout):
        self.w0, self.b0 = w0, b0
        self.wm, self.bm = wm, bm
        self.wl, self.bl = wl, bl
        self.n_mid = int(n_mid)
        self.din = int(din)
        self.dout = int(dout)

    def tree_flatten(self):
        return ((self.w0, self.b0, self.wm, self.bm, self.wl, self.bl),
                (self.n_mid, self.din, self.dout))

    @classmethod
    def tree_unflatten(cls, aux, children):
        n_mid, din, dout = aux
        return cls(*children, n_mid=n_mid, din=din, dout=dout)


def prepare_params(params):
    """One-time packing: pad feature dims to multiples of 128, cast weights to
    bf16, stack the middle (residual) layers. Run once outside the jitted
    forward (re-padding per call costs more than the kernel for small B)."""
    assert len(params) >= 2, "need at least [in->hidden, hidden->out]"
    Din = params[0][0].shape[0]
    H = params[0][0].shape[1]
    Dout = params[-1][0].shape[1]
    for w, _ in params[1:-1]:
        assert w.shape == (H, H), "middle (residual) layers must be hidden->hidden"
    assert params[-1][0].shape[0] == H
    n_mid = len(params) - 2

    Pin = _round_up(Din, 128)
    Ph = _round_up(H, 128)
    Po = _round_up(Dout, 128)

    w0, b0 = params[0]
    wl, bl = params[-1]
    w0_p = _pad2d(jnp.asarray(w0, jnp.float32), Pin, Ph).astype(jnp.bfloat16)
    b0_p = jnp.pad(jnp.asarray(b0, jnp.float32), (0, Ph - H)).reshape(1, Ph)
    wl_p = _pad2d(jnp.asarray(wl, jnp.float32), Ph, Po).astype(jnp.bfloat16)
    bl_p = jnp.pad(jnp.asarray(bl, jnp.float32), (0, Po - Dout)).reshape(1, Po)

    if n_mid > 0:
        wm_p = jnp.stack([_pad2d(jnp.asarray(w, jnp.float32), Ph, Ph)
                          for w, _ in params[1:-1]]).astype(jnp.bfloat16)
        bm_p = jnp.stack([jnp.pad(jnp.asarray(b, jnp.float32), (0, Ph - H)).reshape(1, Ph)
                          for _, b in params[1:-1]])
    else:
        # Minimal dummy so the kernel signature stays fixed; never read.
        wm_p = jnp.zeros((1, 8, 128), jnp.bfloat16)
        bm_p = jnp.zeros((1, 1, 128), jnp.float32)

    return PackedMLP(w0_p, b0_p, wm_p, bm_p, wl_p, bl_p,
                     n_mid=n_mid, din=Din, dout=Dout)


# -----------------------------------------------------------------------------
# Kernels
# -----------------------------------------------------------------------------
def _mlp_resident_kernel(x_ref, w0_ref, b0_ref, wm_ref, bm_ref, wl_ref, bl_ref,
                         o_ref, *, n_mid: int):
    """Whole MLP for one batch tile; all weights resident in VMEM."""
    # first layer: relu(x @ W0 + b0)   (x already bf16, f32 accumulation)
    h = jnp.dot(x_ref[...], w0_ref[...], preferred_element_type=jnp.float32)
    h = jnp.maximum(h + b0_ref[...], 0.0)

    def layer(l, h):
        y = jnp.dot(h.astype(jnp.bfloat16), wm_ref[l],
                    preferred_element_type=jnp.float32)
        # dropout is identity in eval mode
        return jnp.maximum(y + bm_ref[l] + h, 0.0)

    if n_mid > 0:
        if n_mid <= 4:                       # shallow: static unroll
            for l in range(n_mid):
                h = layer(l, h)
        else:                                # deep: compact loop, dynamic index
            h = lax.fori_loop(0, n_mid, layer, h)

    out = jnp.dot(h.astype(jnp.bfloat16), wl_ref[...],
                  preferred_element_type=jnp.float32)
    o_ref[...] = (out + bl_ref[...]).astype(o_ref.dtype)


def _mlp_stream_kernel(x_ref, w0_ref, b0_ref, wm_hbm, bm_ref, wl_ref, bl_ref,
                       o_ref, wbuf, sem, *, n_mid: int):
    """Same MLP, but middle-layer weights are streamed from HBM with a 2-slot
    double buffer (layer l+1 DMA overlapped with layer l matmul). Used when
    the resident stack would blow the VMEM budget (e.g. v7x, large hidden)."""

    def start_fetch(l, slot):
        pltpu.make_async_copy(wm_hbm.at[l], wbuf.at[slot], sem.at[slot]).start()

    start_fetch(0, 0)

    h = jnp.dot(x_ref[...], w0_ref[...], preferred_element_type=jnp.float32)
    h = jnp.maximum(h + b0_ref[...], 0.0)

    def layer(l, h):
        slot = l % 2
        pltpu.make_async_copy(wm_hbm.at[0], wbuf.at[slot], sem.at[slot]).wait()

        @pl.when(l + 1 < n_mid)
        def _():
            start_fetch(l + 1, 1 - slot)

        y = jnp.dot(h.astype(jnp.bfloat16), wbuf[slot],
                    preferred_element_type=jnp.float32)
        return jnp.maximum(y + bm_ref[l] + h, 0.0)

    h = lax.fori_loop(0, n_mid, layer, h)

    out = jnp.dot(h.astype(jnp.bfloat16), wl_ref[...],
                  preferred_element_type=jnp.float32)
    o_ref[...] = (out + bl_ref[...]).astype(o_ref.dtype)


# -----------------------------------------------------------------------------
# Wrapper
# -----------------------------------------------------------------------------
def mlp_forward(x, packed: PackedMLP, *, force_stream_mid: bool = False):
    """Matches MLP.forward (dropout in eval mode = identity)."""
    B, Din = x.shape
    assert Din == packed.din
    Pin, Ph = packed.w0.shape
    Po = packed.wl.shape[1]
    n_mid = packed.n_mid
    Dout = packed.dout

    # --- batch tiling: >=2 even tiles for mid-size batches (both v7x TCs busy),
    # large tiles for big batches, minimal padded rows everywhere.
    if B <= 16:
        TM = _round_up(B, 8)
    elif B <= 1024:
        TM = _round_up(-(-B // 2), 8)        # ceil(B/2), sublane-aligned
    else:
        TM = 512
    B_pad = _round_up(B, TM)
    n_tiles = B_pad // TM

    # bf16 on the wire: halves the only per-grid-step DMA; MXU wanted bf16 anyway.
    x_p = jnp.pad(x.astype(jnp.bfloat16), ((0, B_pad - B), (0, Pin - Din)))

    # --- VMEM budget (weights single-buffered, x/out double-buffered) --------
    BF16, F32 = 2, 4
    w_small = (Pin * Ph + Ph * Po) * BF16 + ((1 + max(n_mid, 1)) * Ph + Po) * F32
    mid_resident = n_mid * Ph * Ph * BF16
    io_bytes = 2 * TM * Pin * BF16 + 2 * TM * Po * F32
    act_bytes = 6 * TM * Ph * F32            # h / y / bf16-cast copies headroom
    slack = 4 << 20

    vmem_cap = 64 << 20                      # assume smallest (v7x) if query fails
    try:
        info_cap = pltpu.get_tpu_info().vmem_capacity_bytes
        if info_cap and int(info_cap) > 0:
            vmem_cap = int(info_cap)
    except Exception:
        pass
    budget_cap = (vmem_cap * 3) // 4         # ~48 MiB on v7x, ~96 MiB on v5e/v6e

    resident_total = w_small + mid_resident + io_bytes + act_bytes + slack
    stream_mid = (force_stream_mid or resident_total > budget_cap) and n_mid > 0

    if stream_mid:
        needed = w_small + 2 * Ph * Ph * BF16 + io_bytes + act_bytes + slack
    else:
        needed = resident_total
    vmem_limit = int(min(max(needed, 32 << 20), budget_cap))

    # --- cost estimate (advisory, helps XLA schedule around the call) --------
    flops = 2 * B_pad * (Pin * Ph + n_mid * Ph * Ph + Ph * Po)
    wm_reads = n_tiles if stream_mid else 1
    bytes_accessed = (B_pad * Pin * BF16 + B_pad * Po * F32
                      + (Pin * Ph + Ph * Po) * BF16
                      + n_mid * Ph * Ph * BF16 * wm_reads
                      + ((1 + n_mid) * Ph + Po) * F32)
    cost = pl.CostEstimate(flops=int(flops), transcendentals=0,
                           bytes_accessed=int(bytes_accessed))

    # --- specs ----------------------------------------------------------------
    def _resident_spec(arr):
        # Grid-invariant operand: same block every step -> single buffer.
        idx = (lambda i: (0, 0)) if arr.ndim == 2 else (lambda i: (0, 0, 0))
        return pl.BlockSpec(arr.shape, idx, pipeline_mode=pl.Buffered(1))

    x_spec = pl.BlockSpec((TM, Pin), lambda i: (i, 0))
    out_spec = pl.BlockSpec((TM, Po), lambda i: (i, 0))   # lane-dense (Po % 128 == 0)

    if not stream_mid:
        kernel = functools.partial(_mlp_resident_kernel, n_mid=n_mid)
        in_specs = [x_spec,
                    _resident_spec(packed.w0), _resident_spec(packed.b0),
                    _resident_spec(packed.wm), _resident_spec(packed.bm),
                    _resident_spec(packed.wl), _resident_spec(packed.bl)]
        scratch_shapes = []
    else:
        kernel = functools.partial(_mlp_stream_kernel, n_mid=n_mid)
        in_specs = [x_spec,
                    _resident_spec(packed.w0), _resident_spec(packed.b0),
                    pl.BlockSpec(memory_space=pl.ANY),     # wm stays in HBM
                    _resident_spec(packed.bm),
                    _resident_spec(packed.wl), _resident_spec(packed.bl)]
        scratch_shapes = [pltpu.VMEM((2, Ph, Ph), jnp.bfloat16),
                          pltpu.SemaphoreType.DMA((2,))]

    out_padded = pl.pallas_call(
        kernel,
        out_shape=jax.ShapeDtypeStruct((B_pad, Po), jnp.float32),
        grid_spec=pltpu.PrefetchScalarGridSpec(
            num_scalar_prefetch=0,
            grid=(n_tiles,),
            in_specs=in_specs,
            out_specs=out_spec,
            scratch_shapes=scratch_shapes,
        ),
        compiler_params=pltpu.CompilerParams(
            dimension_semantics=("parallel",),
            vmem_limit_bytes=vmem_limit,
        ),
        cost_estimate=cost,
    )(x_p, packed.w0, packed.b0, packed.wm, packed.bm, packed.wl, packed.bl)

    return out_padded[:B, :Dout]


# -----------------------------------------------------------------------------
# Init + pure-JAX reference + self-test
# -----------------------------------------------------------------------------
def init_mlp_params(key, input_size, num_categories, hidden_size, num_layers):
    """Deterministic init mimicking torch.nn.Linear default (U[-1/sqrt(fan_in), ...])."""
    dims = [input_size] + [hidden_size] * num_layers + [num_categories]
    params = []
    for i in range(len(dims) - 1):
        fan_in, fan_out = dims[i], dims[i + 1]
        key, kw, kb = jax.random.split(key, 3)
        bound = 1.0 / jnp.sqrt(jnp.float32(fan_in))
        # stored as [D_in, D_out] (transposed vs. torch's [out, in])
        w = jax.random.uniform(kw, (fan_in, fan_out), jnp.float32, -bound, bound)
        b = jax.random.uniform(kb, (fan_out,), jnp.float32, -bound, bound)
        params.append((w, b))
    return params


def mlp_forward_ref(x, params):
    """Pure-JAX f32 reference for correctness checking."""
    w0, b0 = params[0]
    h = jax.nn.relu(x @ w0 + b0)
    for w, b in params[1:-1]:
        h = jax.nn.relu(h @ w + b + h)
    wl, bl = params[-1]
    return h @ wl + bl


if __name__ == "__main__":
    batch = 8
    input_size = 32
    hidden_size = 32
    num_layers = 3          # -> layers: [in->h, h->h, h->h, h->out]
    num_categories = 16

    key = jax.random.PRNGKey(0)
    key, kx = jax.random.split(key)
    x = jax.random.normal(kx, (batch, input_size), jnp.float32)

    params = init_mlp_params(key, input_size, num_categories, hidden_size, num_layers)
    packed = prepare_params(params)          # one-time pack (pad + bf16 + stack)

    ref = mlp_forward_ref(x, params)

    # Resident-weight path (default).
    fwd = jax.jit(mlp_forward)
    out = jax.block_until_ready(fwd(x, packed))
    assert out.shape == (batch, num_categories)
    # bf16 MXU inputs with f32 accumulation -> relaxed tolerance vs f32 reference
    assert jnp.allclose(out, ref, atol=5e-2, rtol=5e-2), (
        f"resident path: max abs diff {jnp.max(jnp.abs(out - ref))}")

    # HBM-streaming middle-layer path (v7x / large-hidden fallback), forced here
    # at small shapes to verify it too.
    fwd_stream = jax.jit(functools.partial(mlp_forward, force_stream_mid=True))
    out_s = jax.block_until_ready(fwd_stream(x, packed))
    assert jnp.allclose(out_s, ref, atol=5e-2, rtol=5e-2), (
        f"stream path: max abs diff {jnp.max(jnp.abs(out_s - ref))}")

    print("KERNEL_OK")
</pallas_src>

<mosaic_0001>
module attributes {stable_mosaic.version = 11 : i64} {
  func.func @_mlp_resident_kernel(%arg0: i32, %arg1: memref<8x128xbf16, #tpu.memory_space<vmem>>, %arg2: memref<128x128xbf16, #tpu.memory_space<vmem>>, %arg3: memref<1x128xf32, #tpu.memory_space<vmem>>, %arg4: memref<2x128x128xbf16, #tpu.memory_space<vmem>>, %arg5: memref<2x1x128xf32, #tpu.memory_space<vmem>>, %arg6: memref<128x128xbf16, #tpu.memory_space<vmem>>, %arg7: memref<1x128xf32, #tpu.memory_space<vmem>>, %arg8: memref<8x128xf32, #tpu.memory_space<vmem>>) attributes {dimension_semantics = [#tpu.dimension_semantics<parallel>], iteration_bounds = array<i64: 1>, scalar_prefetch = 0 : i64, scratch_operands = 0 : i64, tpu.core_type = #tpu.core_type<tc>, window_params = [{transform_indices = @transform_0, window_bounds = array<i64: 8, 128>}, {pipeline_mode = #tpu.pipeline_mode<synchronous>, transform_indices = @transform_1, window_bounds = array<i64: 128, 128>}, {pipeline_mode = #tpu.pipeline_mode<synchronous>, transform_indices = @transform_2, window_bounds = array<i64: 1, 128>}, {pipeline_mode = #tpu.pipeline_mode<synchronous>, transform_indices = @transform_3, window_bounds = array<i64: 2, 128, 128>}, {pipeline_mode = #tpu.pipeline_mode<synchronous>, transform_indices = @transform_4, window_bounds = array<i64: 2, 1, 128>}, {pipeline_mode = #tpu.pipeline_mode<synchronous>, transform_indices = @transform_5, window_bounds = array<i64: 128, 128>}, {pipeline_mode = #tpu.pipeline_mode<synchronous>, transform_indices = @transform_6, window_bounds = array<i64: 1, 128>}, {transform_indices = @transform_7, window_bounds = array<i64: 8, 128>}]} {
    %c0 = arith.constant 0 : index
    %c0_0 = arith.constant 0 : index
    %0 = vector.load %arg1[%c0, %c0_0] : memref<8x128xbf16, #tpu.memory_space<vmem>>, vector<8x128xbf16>
    %c0_1 = arith.constant 0 : index
    %c0_2 = arith.constant 0 : index
    %1 = vector.load %arg2[%c0_1, %c0_2] : memref<128x128xbf16, #tpu.memory_space<vmem>>, vector<128x128xbf16>
    %cst = arith.constant dense<0.000000e+00> : vector<8x128xf32>
    %2 = tpu.matmul %0, %1, %cst {dimension_numbers = #tpu.dot_dimension_numbers<[1], [0], [0], [1], [0, 0, 1, 1], [], []>} : vector<8x128xbf16>, vector<128x128xbf16>, vector<8x128xf32> -> vector<8x128xf32>
    %c0_3 = arith.constant 0 : index
    %c0_4 = arith.constant 0 : index
    %3 = vector.load %arg3[%c0_3, %c0_4] : memref<1x128xf32, #tpu.memory_space<vmem>>, vector<1x128xf32>
    %4 = vector.broadcast %3 : vector<1x128xf32> to vector<8x128xf32>
    %5 = arith.addf %2, %4 : vector<8x128xf32>
    %cst_5 = arith.constant 0.000000e+00 : f32
    %6 = vector.broadcast %cst_5 : f32 to vector<8x128xf32>
    %7 = arith.maximumf %5, %6 : vector<8x128xf32>
    %8 = arith.truncf %7 : vector<8x128xf32> to vector<8x128xbf16>
    %c0_6 = arith.constant 0 : index
    %c0_7 = arith.constant 0 : index
    %c0_8 = arith.constant 0 : index
    %9 = vector.load %arg4[%c0_6, %c0_7, %c0_8] : memref<2x128x128xbf16, #tpu.memory_space<vmem>>, vector<1x128x128xbf16>
    %10 = vector.shape_cast %9 : vector<1x128x128xbf16> to vector<128x128xbf16>
    %cst_9 = arith.constant dense<0.000000e+00> : vector<8x128xf32>
    %11 = tpu.matmul %8, %10, %cst_9 {dimension_numbers = #tpu.dot_dimension_numbers<[1], [0], [0], [1], [0, 0, 1, 1], [], []>} : vector<8x128xbf16>, vector<128x128xbf16>, vector<8x128xf32> -> vector<8x128xf32>
    %c0_10 = arith.constant 0 : index
    %c0_11 = arith.constant 0 : index
    %c0_12 = arith.constant 0 : index
    %12 = vector.load %arg5[%c0_10, %c0_11, %c0_12] : memref<2x1x128xf32, #tpu.memory_space<vmem>>, vector<1x1x128xf32>
    %13 = vector.shape_cast %12 : vector<1x1x128xf32> to vector<1x128xf32>
    %14 = vector.broadcast %13 : vector<1x128xf32> to vector<8x128xf32>
    %15 = arith.addf %11, %14 : vector<8x128xf32>
    %16 = arith.addf %15, %7 : vector<8x128xf32>
    %cst_13 = arith.constant 0.000000e+00 : f32
    %17 = vector.broadcast %cst_13 : f32 to vector<8x128xf32>
    %18 = arith.maximumf %16, %17 : vector<8x128xf32>
    %19 = arith.truncf %18 : vector<8x128xf32> to vector<8x128xbf16>
    %c1 = arith.constant 1 : index
    %c0_14 = arith.constant 0 : index
    %c0_15 = arith.constant 0 : index
    %20 = vector.load %arg4[%c1, %c0_14, %c0_15] : memref<2x128x128xbf16, #tpu.memory_space<vmem>>, vector<1x128x128xbf16>
    %21 = vector.shape_cast %20 : vector<1x128x128xbf16> to vector<128x128xbf16>
    %cst_16 = arith.constant dense<0.000000e+00> : vector<8x128xf32>
    %22 = tpu.matmul %19, %21, %cst_16 {dimension_numbers = #tpu.dot_dimension_numbers<[1], [0], [0], [1], [0, 0, 1, 1], [], []>} : vector<8x128xbf16>, vector<128x128xbf16>, vector<8x128xf32> -> vector<8x128xf32>
    %c1_17 = arith.constant 1 : index
    %c0_18 = arith.constant 0 : index
    %c0_19 = arith.constant 0 : index
    %23 = vector.load %arg5[%c1_17, %c0_18, %c0_19] : memref<2x1x128xf32, #tpu.memory_space<vmem>>, vector<1x1x128xf32>
    %24 = vector.shape_cast %23 : vector<1x1x128xf32> to vector<1x128xf32>
    %25 = vector.broadcast %24 : vector<1x128xf32> to vector<8x128xf32>
    %26 = arith.addf %22, %25 : vector<8x128xf32>
    %27 = arith.addf %26, %18 : vector<8x128xf32>
    %cst_20 = arith.constant 0.000000e+00 : f32
    %28 = vector.broadcast %cst_20 : f32 to vector<8x128xf32>
    %29 = arith.maximumf %27, %28 : vector<8x128xf32>
    %30 = arith.truncf %29 : vector<8x128xf32> to vector<8x128xbf16>
    %c0_21 = arith.constant 0 : index
    %c0_22 = arith.constant 0 : index
    %31 = vector.load %arg6[%c0_21, %c0_22] : memref<128x128xbf16, #tpu.memory_space<vmem>>, vector<128x128xbf16>
    %cst_23 = arith.constant dense<0.000000e+00> : vector<8x128xf32>
    %32 = tpu.matmul %30, %31, %cst_23 {dimension_numbers = #tpu.dot_dimension_numbers<[1], [0], [0], [1], [0, 0, 1, 1], [], []>} : vector<8x128xbf16>, vector<128x128xbf16>, vector<8x128xf32> -> vector<8x128xf32>
    %c0_24 = arith.constant 0 : index
    %c0_25 = arith.constant 0 : index
    %33 = vector.load %arg7[%c0_24, %c0_25] : memref<1x128xf32, #tpu.memory_space<vmem>>, vector<1x128xf32>
    %34 = vector.broadcast %33 : vector<1x128xf32> to vector<8x128xf32>
    %35 = arith.addf %32, %34 : vector<8x128xf32>
    %c0_26 = arith.constant 0 : index
    %c0_27 = arith.constant 0 : index
    %36 = vector.load %arg8[%c0_26, %c0_27] : memref<8x128xf32, #tpu.memory_space<vmem>>, vector<8x128xf32>
    tpu.vector_store %arg8[%c0_26, %c0_27], %35 {strides = array<i32>} : memref<8x128xf32, #tpu.memory_space<vmem>>, vector<8x128xf32>,
    return
  }
  func.func @transform_0(%arg0: i32) -> (i32, i32) {
    %c0_i32 = arith.constant 0 : i32
    %c0_i32_0 = arith.constant 0 : i32
    return %arg0, %c0_i32 : i32, i32
  }
  func.func @transform_1(%arg0: i32) -> (i32, i32) {
    %c0_i32 = arith.constant 0 : i32
    %c0_i32_0 = arith.constant 0 : i32
    %c0_i32_1 = arith.constant 0 : i32
    return %c0_i32, %c0_i32_0 : i32, i32
  }
  func.func @transform_2(%arg0: i32) -> (i32, i32) {
    %c0_i32 = arith.constant 0 : i32
    %c0_i32_0 = arith.constant 0 : i32
    %c0_i32_1 = arith.constant 0 : i32
    return %c0_i32, %c0_i32_0 : i32, i32
  }
  func.func @transform_3(%arg0: i32) -> (i32, i32, i32) {
    %c0_i32 = arith.constant 0 : i32
    %c0_i32_0 = arith.constant 0 : i32
    %c0_i32_1 = arith.constant 0 : i32
    %c0_i32_2 = arith.constant 0 : i32
    return %c0_i32, %c0_i32_0, %c0_i32_1 : i32, i32, i32
  }
  func.func @transform_4(%arg0: i32) -> (i32, i32, i32) {
    %c0_i32 = arith.constant 0 : i32
    %c0_i32_0 = arith.constant 0 : i32
    %c0_i32_1 = arith.constant 0 : i32
    %c0_i32_2 = arith.constant 0 : i32
    return %c0_i32, %c0_i32_0, %c0_i32_1 : i32, i32, i32
  }
  func.func @transform_5(%arg0: i32) -> (i32, i32) {
    %c0_i32 = arith.constant 0 : i32
    %c0_i32_0 = arith.constant 0 : i32
    %c0_i32_1 = arith.constant 0 : i32
    return %c0_i32, %c0_i32_0 : i32, i32
  }
  func.func @transform_6(%arg0: i32) -> (i32, i32) {
    %c0_i32 = arith.constant 0 : i32
    %c0_i32_0 = arith.constant 0 : i32
    %c0_i32_1 = arith.constant 0 : i32
    return %c0_i32, %c0_i32_0 : i32, i32
  }
  func.func @transform_7(%arg0: i32) -> (i32, i32) {
    %c0_i32 = arith.constant 0 : i32
    %c0_i32_0 = arith.constant 0 : i32
    return %arg0, %c0_i32 : i32, i32
  }
}

</mosaic_0001>

<bundles_post_ra>
// kernel: mlp_forward.1
= control target key start
LH: loop header
LB: loop body
LE: loop exit
PB: predicated region body
PF: predicated region fallthrough
CT: control target
= control target key end

     0   :  { %12 = vsyncpa [#allocation3], 0  ;;  %s774_s0 = inlined_call_operand.vmem [shape: bf16[8,128], index: 0, kind: input, shape index: {}]   ;;  %s775_s1 = inlined_call_operand.hbm [shape: bf16[128,128], index: 1, kind: input, shape index: {}]   ;;  %s776_s2 = inlined_call_operand.vmem [shape: f32[1,128], index: 2, kind: input, shape index: {}]   ;;  %s777_s3 = inlined_call_operand.hbm [shape: bf16[2,128,128], index: 3, kind: input, shape index: {}]   ;;  %s778_s4 = inlined_call_operand.vmem [shape: f32[2,1,128], index: 4, kind: input, shape index: {}]   ;;  %s779_s5 = inlined_call_operand.hbm [shape: bf16[128,128], index: 5, kind: input, shape index: {}]   ;;  %s780_s6 = inlined_call_operand.vmem [shape: f32[1,128], index: 6, kind: input, shape index: {}]   ;;  %s781_s7 = inlined_call_operand.hbm [shape: f32[8,128], index: 7, kind: output, shape index: {}]  }
   0x1   :  { %13 = vsyncpa [#allocation6], 0 }
   0x2   :  { %14 = vsyncpa [#allocation4], 0  ;;  %s36_s26 = sshll.u32 %s777_s3, 4  ;;  %s701_s27 = smov [#allocation5]   ;;  %s37_s26 = int_to_ptr.hbm [resolvable:$true] %s36_s26 }
   0x3   :  { %s38_s28 = sshll.u32 %s701_s27, 4  ;;  %s21_s8 = sshll.u32 %s775_s1, 4  ;;  %s39_s28 = int_to_ptr.vmem [resolvable:$true] %s38_s28  ;;  %s22_s8 = int_to_ptr.hbm [resolvable:$true] %s21_s8 }
   0x4   :  { %s702_s9 = smov 64   ;;  %s703_s10 = smov 4  }
   0x5   :  { %44 = dma.hbm_to_vmem [thread:$0]  %s37_s26, 2048, %s39_s28, [#allocation6], %s702_s9, %s702_s9, %s703_s10  }
   0x6   :  { %s704_s11 = smov [#allocation2]   ;;  %s51_s15 = sshll.u32 %s779_s5, 4  ;;  %s52_s15 = int_to_ptr.hbm [resolvable:$true] %s51_s15 }
   0x7   :  { %s23_s12 = sshll.u32 %s704_s11, 4  ;;  %s705_s3 = smov [#allocation7]   ;;  %s24_s12 = int_to_ptr.vmem [resolvable:$true] %s23_s12 }
   0x8   :  { %29 = dma.hbm_to_vmem [thread:$0]  %s22_s8, 1024, %s24_s12, [#allocation3], %s702_s9, %s702_s9, %s703_s10  }
   0x9   :  { %s53_s16 = sshll.u32 %s705_s3, 4  ;;  %s54_s16 = int_to_ptr.vmem [resolvable:$true] %s53_s16 }
   0xa   :  { %59 = dma.hbm_to_vmem [thread:$0]  %s52_s15, 1024, %s54_s16, [#allocation6], %s702_s9, %s702_s9, %s703_s10  }
   0xb   :  { %695 = dma.done.wait [#allocation3], 1024  }
   0xc   :  { %696 = vsyncadd [#allocation3], 4294966272 }
   0xd   :  { %697 = dma.done.wait [#allocation6], 3072  }
   0xe   :  { %698 = vsyncadd [#allocation6], 4294964224  ;;  %v564_v0 = vld [vmem:[#allocation2 + $0x38] sm:$0xff]  ;;  %v563_v1 = vld [vmem:[#allocation2 + $0x30] sm:$0xff]  ;;  %s706_s23 = smov [#allocation8]   ;;  %s417_s27 = sshll.u32 %s781_s7, 4  ;;  %s418_s27 = int_to_ptr.hbm [resolvable:$true] %s417_s27 }
   0xf   :  { %143 = vmatpush.bf16.msra.mxu0 %v564_v0  ;;  %v572_v2 = vld [vmem:[#allocation5 + $0x38] sm:$0xff]  ;;  %v571_v3 = vld [vmem:[#allocation5 + $0x30] sm:$0xff]  ;;  %v562_v4 = vld [vmem:[#allocation2 + $0x28] sm:$0xff]  ;;  %s415_s24 = sshll.u32 %s706_s23, 4  ;;  %s416_s24 = int_to_ptr.vmem [resolvable:$true] %s415_s24 }
  0x10   :  { %226 = vmatpush.bf16.msra.mxu1 %v572_v2  ;;  %v570_v5 = vld [vmem:[#allocation5 + $0x28] sm:$0xff]  ;;  %v561_v6 = vld [vmem:[#allocation2 + $0x20] sm:$0xff]  ;;  %v560_v8 = vld [vmem:[#allocation2 + $0x18] sm:$0xff] }
  0x11   :  { %v569_v7 = vld [vmem:[#allocation5 + $0x20] sm:$0xff]  ;;  %v568_v9 = vld [vmem:[#allocation5 + $0x18] sm:$0xff]  ;;  %v559_v10 = vld [vmem:[#allocation2 + $0x10] sm:$0xff] }
  0x12   :  { %v567_v11 = vld [vmem:[#allocation5 + $0x10] sm:$0xff]  ;;  %v558_v12 = vld [vmem:[#allocation2 + $0x8] sm:$0xff]  ;;  %v557_v13 = vld [vmem:[#allocation2] sm:$0xff] }
  0x13   :  { %144 = vmatpush.bf16.msra.mxu0 %v563_v1  ;;  %v74_v14 = vld [vmem:[%s774_s0] sm:$0xf]  ;;  %v566_v15 = vld [vmem:[#allocation5 + $0x8] sm:$0xff]  ;;  %v580_v17 = vld [vmem:[#allocation5 + $0x78] sm:$0xff] }
  0x14   :  { %227 = vmatpush.bf16.msra.mxu1 %v571_v3  ;;  %v565_v16 = vld [vmem:[#allocation5] sm:$0xff]  ;;  %312 = vmatpush.bf16.msra.mxu2 %v580_v17  ;;  %v579_v18 = vld [vmem:[#allocation5 + $0x70] sm:$0xff]  ;;  %v578_v19 = vld [vmem:[#allocation5 + $0x68] sm:$0xff] }
  0x15   :  { %v577_v20 = vld [vmem:[#allocation5 + $0x60] sm:$0xff]  ;;  %v576_v21 = vld [vmem:[#allocation5 + $0x58] sm:$0xff]  ;;  %v575_v22 = vld [vmem:[#allocation5 + $0x50] sm:$0xff] }
  0x16   :  { %v595_v23 = vld [vmem:[%s776_s2] ss:$0 sm:$0xff]  ;;  %v574_v29 = vld [vmem:[#allocation5 + $0x48] sm:$0xff]  ;;  %v588_v31 = vld [vmem:[#allocation7 + $0x38] sm:$0xff] }
  0x17   :  { %145 = vmatpush.bf16.msra.mxu0 %v562_v4  ;;  %v573_v30 = vld [vmem:[#allocation5 + $0x40] sm:$0xff]  ;;  %396 = vmatpush.bf16.msra.mxu3 %v588_v31  ;;  %v587_v32 = vld [vmem:[#allocation7 + $0x30] sm:$0xff]  ;;  %v586_v33 = vld [vmem:[#allocation7 + $0x28] sm:$0xff] }
  0x18   :  { %228 = vmatpush.bf16.msra.mxu1 %v570_v5  ;;  %313 = vmatpush.bf16.msra.mxu2 %v579_v18  ;;  %v585_v34 = vld [vmem:[#allocation7 + $0x20] sm:$0xff]  ;;  %v584_v35 = vld [vmem:[#allocation7 + $0x18] sm:$0xff]  ;;  %v583_v36 = vld [vmem:[#allocation7 + $0x10] sm:$0xff] }
  0x19   :  { %v596_v37 = vld [vmem:[%s778_s4] ss:$0 sm:$0xff]  ;;  %v582_v44 = vld [vmem:[#allocation7 + $0x8] sm:$0xff]  ;;  %v597_v46 = vld [vmem:[%s778_s4 + $0x1] ss:$0 sm:$0xff] }
  0x1a   :  { %v581_v45 = vld [vmem:[#allocation7] sm:$0xff] }
  0x1b   :  { %146 = vmatpush.bf16.msra.mxu0 %v561_v6  ;;  %397 = vmatpush.bf16.msra.mxu3 %v587_v32  ;;  %v598_v53 = vld [vmem:[%s780_s6] ss:$0 sm:$0xff] }
  0x1c   :  { %229 = vmatpush.bf16.msra.mxu1 %v569_v7  ;;  %314 = vmatpush.bf16.msra.mxu2 %v578_v19 }
  0x1f   :  { %147 = vmatpush.bf16.msra.mxu0 %v560_v8  ;;  %398 = vmatpush.bf16.msra.mxu3 %v586_v33 }
  0x20   :  { %230 = vmatpush.bf16.msra.mxu1 %v568_v9  ;;  %315 = vmatpush.bf16.msra.mxu2 %v577_v20 }
  0x23   :  { %148 = vmatpush.bf16.msra.mxu0 %v559_v10  ;;  %399 = vmatpush.bf16.msra.mxu3 %v585_v34 }
  0x24   :  { %231 = vmatpush.bf16.msra.mxu1 %v567_v11  ;;  %316 = vmatpush.bf16.msra.mxu2 %v576_v21 }
  0x27   :  { %149 = vmatpush.bf16.msra.mxu0 %v558_v12  ;;  %400 = vmatpush.bf16.msra.mxu3 %v584_v35 }
  0x28   :  { %232 = vmatpush.bf16.msra.mxu1 %v566_v15  ;;  %317 = vmatpush.bf16.msra.mxu2 %v575_v22 }
  0x2b   :  { %150 = vmatpush.bf16.msra.mxu0 %v557_v13  ;;  %401 = vmatpush.bf16.msra.mxu3 %v583_v36 }
  0x2c   :  { %233 = vmatpush.bf16.msra.mxu1 %v565_v16  ;;  %318 = vmatpush.bf16.msra.mxu2 %v574_v29 }
  0x2e   :  { %151 = vmatmul.bf16.vlgmr.msra.gmra.mxu0 %v74_v14 }
  0x2f   :  { %402 = vmatpush.bf16.msra.mxu3 %v582_v44 }
  0x30   :  { %319 = vmatpush.bf16.msra.mxu2 %v573_v30 }
  0x33   :  { %403 = vmatpush.bf16.msra.mxu3 %v581_v45 }
  0xab   :  { %v152_v24 = vpop.f32.mrf.mxu0 }
  0xac   :  { %v153_v25 = vadd.f32 %v595_v23, %v152_v24 }
  0xae   :  { %v156_v26 = vmax.f32 %v153_v25, 0.0 }
  0xb0   :  { %v157_v27 = vpack.c.bf16 %v156_v26, %v156_v26 }
  0xb2   :  { %234 = vmatmul.bf16.vlgmr.msra.gmra.mxu1 %v157_v27 }
  0xb3   :  { %v154_v28 = vpop.f32.mrf.mxu0 }
 0x12f   :  { %v235_v38 = vpop.f32.mrf.mxu1 }
 0x130   :  { %v236_v39 = vadd.f32 %v596_v37, %v235_v38 }
 0x132   :  { %v239_v40 = vadd.f32 %v236_v39, %v156_v26 }
 0x134   :  { %v240_v41 = vmax.f32 %v239_v40, 0.0 }
 0x136   :  { %v241_v42 = vpack.c.bf16 %v240_v41, %v240_v41 }
 0x137   :  { %v237_v43 = vpop.f32.mrf.mxu1 }
 0x138   :  { %320 = vmatmul.bf16.vlgmr.msra.gmra.mxu2 %v241_v42 }
 0x1bb   :  { %v321_v47 = vpop.f32.mrf.mxu2 }
 0x1bc   :  { %v322_v48 = vadd.f32 %v597_v46, %v321_v47 }
 0x1be   :  { %v325_v49 = vadd.f32 %v322_v48, %v240_v41 }
 0x1c0   :  { %v326_v50 = vmax.f32 %v325_v49, 0.0 }
 0x1c2   :  { %v327_v51 = vpack.c.bf16 %v326_v50, %v326_v50 }
 0x1c3   :  { %v323_v52 = vpop.f32.mrf.mxu2 }
 0x1c4   :  { %404 = vmatmul.bf16.vlgmr.msra.gmra.mxu3 %v327_v51 }
 0x247   :  { %v405_v54 = vpop.f32.mrf.mxu3 }
 0x248   :  { %v406_v55 = vadd.f32 %v598_v53, %v405_v54 }
 0x24a   :  { %409 = vst [vmem:[#allocation8] sm:$0xff] %v406_v55 }
 0x24b   :  { %420 = dma.vmem_to_hbm [thread:$0]  %s416_s24, 128, %s418_s27, [#allocation4]  }
 0x24f   :  { %v407_v56 = vpop.f32.mrf.mxu3 }
 0x250   :  { %699 = dma.done.wait [#allocation4], 128  }
 0x251   :  { %700 = vsyncadd [#allocation4], 4294967168 }
 0x252   :  { %425 = vsyncpa [#allocation3], 1 }
 0x253   :  { %426 = vsyncpa [#allocation6], 1 }
 0x254   :  { %427 = vsyncpa [#allocation4], 1 }

</bundles_post_ra>
